<compile_context>
chip_gen: v7x
topology: tpu7x:2x2x1
jax: 0.10.0
libtpu: 0.0.40
codegen_flags: <defaults>
</compile_context>

<pallas_src>
import jax
import jax.numpy as jnp
from jax.experimental import pallas as pl


_HEAD_ORDER = ("probs", "translations", "rotations", "sizes", "shapes",
               "deformations")

# Head -> output nonlinearity applied to the 1x1x1-conv result at (0,0,0).
# "shapes" is the head whose nonlinearity is given by the spec:
#   sigmoid(.) * 1.1 + 0.4
# TODO(synk): head-specific output nonlinearities for probs / translations /
#             rotations / sizes / deformations (tanh scaling, quaternion
#             normalisation, ...) are not part of the provided module spec;
#             those heads return the raw 1x1x1-conv output at (0,0,0).
_HEAD_ACTIVATION = {"shapes": "shape"}


def _apply_activation(name, s):
    if name == "shape":
        return jax.nn.sigmoid(s) * 1.1 + 0.4
    return s  # "linear"


def _full_spec(shape):
    # whole array = one block (everything is tiny after the voxel slice)
    return pl.BlockSpec(shape, lambda: (0,) * len(shape))


def _round_up(x, m):
    return ((x + m - 1) // m) * m


def _build_heads_kernel(n_dense, act_ranges):
    """One fused kernel for every head.

    Refs (in order):
      x1:  (B, C+1)             (0,0,0)-voxel activation + a trailing ones col
      wfc: (C+1, n_dense*C)     [only if n_dense>0] fused dense-FC weights,
                                bias folded into the last row
      w2x: (C+1, OUT_PAD)       non-dense head weights (rows 0:C) + ALL head
                                biases (row C); zeros in dense heads' columns
      w2h: (n_dense*C, OUT_PAD) [only if n_dense>0] block-diagonal dense-head
                                output weights
      out: (B, OUT_PAD)         single lane-dense fused output
    """
    def kernel(*refs):
        if n_dense:
            x_ref, wfc_ref, w2x_ref, w2h_ref, o_ref = refs
        else:
            x_ref, w2x_ref, o_ref = refs

        x1 = x_ref[...]                                            # (B, C+1)
        # Non-dense head weights + every head's bias (via the ones column).
        s = jnp.dot(x1, w2x_ref[...], preferred_element_type=jnp.float32)
        if n_dense:
            # Single fused FC matmul for all dense heads (bias folded in).
            h = jnp.dot(x1, wfc_ref[...], preferred_element_type=jnp.float32)
            h = jnp.where(h >= 0.0, h, 0.2 * h)                    # LeakyReLU
            s = s + jnp.dot(h, w2h_ref[...],
                            preferred_element_type=jnp.float32)
        if act_ranges:
            col = jax.lax.broadcasted_iota(jnp.int32, s.shape, 1)
            for lo, hi, act in act_ranges:
                s = jnp.where((col >= lo) & (col < hi),
                              _apply_activation(act, s), s)
        o_ref[...] = s

    return kernel


def _run_heads(x0, head_specs, head_params):
    """x0: (B, C).  Runs every head in one fused pallas_call.

    head_specs: tuple of (name, out_dim, make_dense, activation).
    Returns dict head-name -> (B, out_dim) float32.
    """
    if not head_specs:
        return {}
    B, C = x0.shape
    f32 = jnp.float32
    dense = [spec for spec in head_specs if spec[2]]
    n_dense = len(dense)
    total_out = sum(spec[1] for spec in head_specs)
    out_pad = _round_up(max(total_out, 128), 128)   # lane-dense fused output

    # ---- pack parameters (tiny, done once in XLA outside the kernel) ------
    x1 = jnp.concatenate([x0.astype(f32), jnp.ones((B, 1), f32)], axis=1)

    wfc = None
    if n_dense:
        wfc = jnp.concatenate(
            [jnp.concatenate(
                [head_params[n]["w_fc"].astype(f32),
                 head_params[n]["b_fc"].astype(f32).reshape(1, C)], axis=0)
             for (n, _, _, _) in dense], axis=1)                 # (C+1, nd*C)

    w2x = jnp.zeros((C + 1, out_pad), f32)
    w2h = jnp.zeros((n_dense * C, out_pad), f32) if n_dense else None
    act_ranges, col_ranges = [], []
    col, j = 0, 0
    for name, out_dim, make_dense, act in head_specs:
        p = head_params[name]
        w = p["w"].astype(f32)                                   # (C, out_dim)
        b = p["b"].astype(f32)                                   # (out_dim,)
        if make_dense:
            w2h = w2h.at[j * C:(j + 1) * C, col:col + out_dim].set(w)
            j += 1
        else:
            w2x = w2x.at[0:C, col:col + out_dim].set(w)
        w2x = w2x.at[C, col:col + out_dim].set(b)
        if act != "linear":
            act_ranges.append((col, col + out_dim, act))
        col_ranges.append((name, col, col + out_dim))
        col += out_dim

    inputs = [x1]
    in_specs = [_full_spec((B, C + 1))]
    if n_dense:
        inputs.append(wfc)
        in_specs.append(_full_spec(wfc.shape))
    inputs.append(w2x)
    in_specs.append(_full_spec(w2x.shape))
    if n_dense:
        inputs.append(w2h)
        in_specs.append(_full_spec(w2h.shape))

    flops = 2 * B * (C + 1) * out_pad
    if n_dense:
        flops += 2 * B * (C + 1) * (n_dense * C)
        flops += 2 * B * (n_dense * C) * out_pad
    cost = pl.CostEstimate(
        flops=flops,
        transcendentals=(2 * B * out_pad) if act_ranges else 0,
        bytes_accessed=4 * (sum(int(a.size) for a in inputs) + B * out_pad))

    out = pl.pallas_call(
        _build_heads_kernel(n_dense, tuple(act_ranges)),
        out_shape=jax.ShapeDtypeStruct((B, out_pad), f32),
        in_specs=in_specs,
        out_specs=_full_spec((B, out_pad)),
        cost_estimate=cost,
    )(*inputs)

    return {name: out[:, lo:hi] for (name, lo, hi) in col_ranges}


def geometric_primitive_forward(X, n_primitives, primitive_params):
    """X: (B, C, D, H, W) float32 (NCDHW, as in PyTorch).

    primitive_params: dict head-name -> {"w": (C, out), "b": (out,),
                                         optional "w_fc": (C, C), "b_fc": (C,)}
    (the PyTorch Conv3d(C, out, 1) weight (out, C, 1, 1, 1) stored as a (C, out)
    matmul weight).

    Returns a dict with keys probs / translations / rotations / sizes / shapes /
    deformations (the fields of PrimitiveParameters).  Heads missing from
    primitive_params get exactly the PyTorch-forward defaults:
    probs = 1, shapes = 0.25, deformations = 0.
    """
    B = X.shape[0]
    # 1x1x1-conv heads are per-voxel and only the (0,0,0) voxel is returned,
    # so slice first: removes the D*H*W factor of FLOPs and HBM traffic (exact).
    # TODO(synk): this slice could be folded into the pallas_call with a
    #             squeezed (B, C, 1, 1, 1) BlockSpec; kept in XLA for robust
    #             lowering (it is a dispatch-latency item only, ~B*C*4 bytes).
    x0 = X[:, :, 0, 0, 0]                                         # (B, C)

    head_specs = tuple(
        (name, primitive_params[name]["w"].shape[1],
         "w_fc" in primitive_params[name],
         _HEAD_ACTIVATION.get(name, "linear"))
        for name in _HEAD_ORDER if name in primitive_params)

    res = _run_heads(x0, head_specs, primitive_params)

    dt = X.dtype
    res = {k: v.astype(dt) for k, v in res.items()}   # consistent output dtype
    if "probs" not in res:
        res["probs"] = jnp.ones((B, n_primitives), dt)
    if "shapes" not in res:
        res["shapes"] = jnp.full((B, 2 * n_primitives), 0.25, dt)
    if "deformations" not in res:
        res["deformations"] = jnp.zeros((B, 2 * n_primitives), dt)
    return res


def shape_forward(X, params, *, make_dense=True):
    """Stand-alone Shape head:
    (sigmoid(conv1(LeakyReLU(fc(X)))) * 1.1 + 0.4)[:, :, 0, 0, 0] -> (B, 2M)."""
    x0 = X[:, :, 0, 0, 0]
    p = {"w": params["w_shape"], "b": params["b_shape"]}
    if make_dense:
        p["w_fc"] = params["w_fc"]
        p["b_fc"] = params["b_fc"]
    spec = (("shapes", params["w_shape"].shape[1], make_dense, "shape"),)
    return _run_heads(x0, spec, {"shapes": p})["shapes"].astype(X.dtype)


def _reference_geometric_primitive(X, n_primitives, primitive_params):
    """Pure-JAX mirror of the PyTorch forward: every head evaluated over the
    FULL volume with 1x1x1 convs, then sliced at (0,0,0) — proves the
    slice-before-kernel optimization is exact."""
    B = X.shape[0]
    xl = jnp.transpose(X, (0, 2, 3, 4, 1))                 # (B, D, H, W, C)
    res = {}
    for name, p in primitive_params.items():
        t = xl
        if "w_fc" in p:
            t = t @ p["w_fc"] + p["b_fc"]
            t = jnp.where(t >= 0.0, t, 0.2 * t)
        s = t @ p["w"] + p["b"]
        s = _apply_activation(_HEAD_ACTIVATION.get(name, "linear"), s)
        res[name] = s[:, 0, 0, 0, :]
    dt = X.dtype
    if "probs" not in res:
        res["probs"] = jnp.ones((B, n_primitives), dt)
    if "shapes" not in res:
        res["shapes"] = jnp.full((B, 2 * n_primitives), 0.25, dt)
    if "deformations" not in res:
        res["deformations"] = jnp.zeros((B, 2 * n_primitives), dt)
    return res


def init_primitive_params(key, input_channels, n_primitives):
    """Heads of a typical learnable_primitives config: translations (3M),
    rotations (4M), sizes (3M), shapes (2M, make_dense); probs / deformations
    absent -> PyTorch-forward defaults."""
    C, M = input_channels, n_primitives
    heads = {"translations": (3 * M, True),
             "rotations": (4 * M, False),
             "sizes": (3 * M, True),
             "shapes": (2 * M, True)}
    keys = iter(jax.random.split(key, 4 * len(heads)))
    params = {}
    for name, (out, make_dense) in heads.items():
        p = {"w": 0.1 * jax.random.normal(next(keys), (C, out), jnp.float32),
             "b": 0.1 * jax.random.normal(next(keys), (out,), jnp.float32)}
        if make_dense:
            p["w_fc"] = 0.1 * jax.random.normal(next(keys), (C, C), jnp.float32)
            p["b_fc"] = 0.1 * jax.random.normal(next(keys), (C,), jnp.float32)
        else:
            next(keys), next(keys)
        params[name] = p
    return params


if __name__ == "__main__":
    B, C, D, H, W = 2, 32, 4, 4, 4
    n_primitives = 8
    M = n_primitives

    key = jax.random.PRNGKey(0)
    kx, kp = jax.random.split(key)
    X = jax.random.normal(kx, (B, C, D, H, W), jnp.float32)
    primitive_params = init_primitive_params(kp, C, n_primitives)

    fwd = jax.jit(lambda x, pp: geometric_primitive_forward(x, n_primitives, pp))
    out = fwd(X, primitive_params)
    out = jax.block_until_ready(out)

    ref = _reference_geometric_primitive(X, n_primitives, primitive_params)

    expected = {"probs": (B, M), "translations": (B, 3 * M),
                "rotations": (B, 4 * M), "sizes": (B, 3 * M),
                "shapes": (B, 2 * M), "deformations": (B, 2 * M)}
    for name, shp in expected.items():
        assert out[name].shape == shp, (name, out[name].shape)
        assert jnp.allclose(out[name], ref[name], atol=1e-5, rtol=1e-5), name

    # Defaults must match the PyTorch branches exactly.
    assert jnp.all(out["probs"] == 1.0)
    assert jnp.all(out["deformations"] == 0.0)

    # Stand-alone Shape head stays numerically exact.
    shp_params = {"w_shape": primitive_params["shapes"]["w"],
                  "b_shape": primitive_params["shapes"]["b"],
                  "w_fc": primitive_params["shapes"]["w_fc"],
                  "b_fc": primitive_params["shapes"]["b_fc"]}
    s = jax.block_until_ready(jax.jit(shape_forward)(X, shp_params))
    assert jnp.allclose(s, ref["shapes"], atol=1e-5, rtol=1e-5)

    print("KERNEL_OK")
</pallas_src>

<mosaic_0001>
module attributes {stable_mosaic.version = 11 : i64} {
  func.func @kernel(%arg0: memref<2x33xf32, #tpu.memory_space<vmem>>, %arg1: memref<33x96xf32, #tpu.memory_space<vmem>>, %arg2: memref<33x128xf32, #tpu.memory_space<vmem>>, %arg3: memref<96x128xf32, #tpu.memory_space<vmem>>, %arg4: memref<2x128xf32, #tpu.memory_space<vmem>>) attributes {dimension_semantics = [], scalar_prefetch = 0 : i64, scratch_operands = 0 : i64, tpu.core_type = #tpu.core_type<tc>} {
    %c0 = arith.constant 0 : index
    %c0_0 = arith.constant 0 : index
    %0 = vector.load %arg0[%c0, %c0_0] : memref<2x33xf32, #tpu.memory_space<vmem>>, vector<2x33xf32>
    %c0_1 = arith.constant 0 : index
    %c0_2 = arith.constant 0 : index
    %1 = vector.load %arg2[%c0_1, %c0_2] : memref<33x128xf32, #tpu.memory_space<vmem>>, vector<33x128xf32>
    %cst = arith.constant dense<0.000000e+00> : vector<2x128xf32>
    %2 = tpu.matmul %0, %1, %cst {dimension_numbers = #tpu.dot_dimension_numbers<[1], [0], [0], [1], [0, 0, 1, 1], [], []>} : vector<2x33xf32>, vector<33x128xf32>, vector<2x128xf32> -> vector<2x128xf32>
    %c0_3 = arith.constant 0 : index
    %c0_4 = arith.constant 0 : index
    %3 = vector.load %arg1[%c0_3, %c0_4] : memref<33x96xf32, #tpu.memory_space<vmem>>, vector<33x96xf32>
    %cst_5 = arith.constant dense<0.000000e+00> : vector<2x96xf32>
    %4 = tpu.matmul %0, %3, %cst_5 {dimension_numbers = #tpu.dot_dimension_numbers<[1], [0], [0], [1], [0, 0, 1, 1], [], []>} : vector<2x33xf32>, vector<33x96xf32>, vector<2x96xf32> -> vector<2x96xf32>
    %cst_6 = arith.constant 0.000000e+00 : f32
    %5 = vector.broadcast %cst_6 : f32 to vector<2x96xf32>
    %6 = arith.cmpf oge, %4, %5 : vector<2x96xf32>
    %cst_7 = arith.constant 2.000000e-01 : f32
    %7 = vector.broadcast %cst_7 : f32 to vector<2x96xf32>
    %8 = arith.mulf %7, %4 : vector<2x96xf32>
    %9 = arith.select %6, %4, %8 : vector<2x96xi1>, vector<2x96xf32>
    %c0_8 = arith.constant 0 : index
    %c0_9 = arith.constant 0 : index
    %10 = vector.load %arg3[%c0_8, %c0_9] : memref<96x128xf32, #tpu.memory_space<vmem>>, vector<96x128xf32>
    %cst_10 = arith.constant dense<0.000000e+00> : vector<2x128xf32>
    %11 = tpu.matmul %9, %10, %cst_10 {dimension_numbers = #tpu.dot_dimension_numbers<[1], [0], [0], [1], [0, 0, 1, 1], [], []>} : vector<2x96xf32>, vector<96x128xf32>, vector<2x128xf32> -> vector<2x128xf32>
    %12 = arith.addf %2, %11 : vector<2x128xf32>
    %13 = tpu.iota {dimensions = array<i32: 1>} : vector<2x128xi32>
    %c80_i32 = arith.constant 80 : i32
    %14 = vector.broadcast %c80_i32 : i32 to vector<2x128xi32>
    %15 = arith.cmpi sge, %13, %14 : vector<2x128xi32>
    %c96_i32 = arith.constant 96 : i32
    %16 = vector.broadcast %c96_i32 : i32 to vector<2x128xi32>
    %17 = arith.cmpi slt, %13, %16 : vector<2x128xi32>
    %18 = arith.andi %15, %17 : vector<2x128xi1>
    %19 = arith.negf %12 : vector<2x128xf32>
    %20 = math.exp %19 : vector<2x128xf32>
    %cst_11 = arith.constant 1.000000e+00 : f32
    %21 = vector.broadcast %cst_11 : f32 to vector<2x128xf32>
    %22 = arith.addf %21, %20 : vector<2x128xf32>
    %23 = arith.divf %21, %22 : vector<2x128xf32>
    %cst_12 = arith.constant 1.100000e+00 : f32
    %24 = vector.broadcast %cst_12 : f32 to vector<2x128xf32>
    %25 = arith.mulf %23, %24 : vector<2x128xf32>
    %cst_13 = arith.constant 4.000000e-01 : f32
    %26 = vector.broadcast %cst_13 : f32 to vector<2x128xf32>
    %27 = arith.addf %25, %26 : vector<2x128xf32>
    %28 = arith.select %18, %27, %12 : vector<2x128xi1>, vector<2x128xf32>
    %c0_14 = arith.constant 0 : index
    %c0_15 = arith.constant 0 : index
    %29 = vector.load %arg4[%c0_14, %c0_15] : memref<2x128xf32, #tpu.memory_space<vmem>>, vector<2x128xf32>
    tpu.vector_store %arg4[%c0_14, %c0_15], %28 {strides = array<i32>} : memref<2x128xf32, #tpu.memory_space<vmem>>, vector<2x128xf32>,
    return
  }
}

</mosaic_0001>

<bundles_post_ra>
// kernel: _lambda_.1
= control target key start
LH: loop header
LB: loop body
LE: loop exit
PB: predicated region body
PF: predicated region fallthrough
CT: control target
= control target key end

     0   :  { %v409_v0 = vmov 0.0|0.0   ;;  %vm410_vm0 = vmmov 0   ;;  %v411_v4 = vmov 0.0   ;;  %vm32_vm1 = vcmask 1040384   ;;  %s516_s1 = inlined_call_operand.vmem [shape: f32[33,96], index: 1, kind: input, shape index: {}]   ;;  %s517_s3 = inlined_call_operand.vmem [shape: f32[96,128], index: 3, kind: input, shape index: {}]   ;;  %s518_s2 = inlined_call_operand.vmem [shape: f32[33,128], index: 2, kind: input, shape index: {}]   ;;  %s519_s0 = inlined_call_operand.vmem [shape: f32[2,33], index: 0, kind: input, shape index: {}]   ;;  %s520_s4 = inlined_call_operand.vmem [shape: f32[2,128], index: 4, kind: output, shape index: {}]  }
   0x1   :  { %371 = vmatprep.subr.bf16.mxu0 %v409_v0  ;;  %v23_v1 = vld [vmem:[%s516_s1] sm:$0xff]  ;;  %v24_v2 = vld [vmem:[%s516_s1 + $0x8] sm:$0xff]  ;;  %v25_v3 = vld [vmem:[%s516_s1 + $0x10] sm:$0xff]  ;;  %328 = vmatprep.mubr.msk.f32.mxu0 %vm410_vm0, %v411_v4  ;;  %vm28_vm2 = vcmask 269312   ;;  %vm121_vm4 = vcmask 785408   ;;  %v268_v47 = vlaneseq }
   0x2   :  { %v372_v5 = vpack.c.bf16 %v24_v2, %v23_v1  ;;  %v26_v6 = vld [vmem:[%s516_s1 + $0x18] sm:$0xff]  ;;  %377 = vmatprep.subr.bf16.mxu1 %v409_v0  ;;  %355 = vmatprep.mubr.msk.f32.mxu1 %vm410_vm0, %v411_v4  ;;  %v109_v7 = vld [vmem:[%s517_s3] sm:$0xff]  ;;  %v110_v8 = vld [vmem:[%s517_s3 + $0x8] sm:$0xff] }
   0x3   :  { %v111_v9 = vld [vmem:[%s517_s3 + $0x10] sm:$0xff]  ;;  %v375_v10 = vpack.c.bf16 %v26_v6, %v25_v3  ;;  %v378_v11 = vpack.c.bf16 %v110_v8, %v109_v7  ;;  %v112_v12 = vld [vmem:[%s517_s3 + $0x18] sm:$0xff]  ;;  %v113_v14 = vld [vmem:[%s517_s3 + $0x20] sm:$0xff]  ;;  %v269_v48 = vand.u32 127, %v268_v47 }
   0x4   :  { %373 = vmatpush3.bf16.msra.mxu0 %v372_v5  ;;  %v381_v13 = vpack.c.bf16 %v112_v12, %v111_v9  ;;  %v114_v15 = vld [vmem:[%s517_s3 + $0x28] sm:$0xff]  ;;  %v18_v16 = vld [vmem:[%s518_s2] sm:$0xff]  ;;  %v115_v21 = vld [vmem:[%s517_s3 + $0x30] sm:$0xff] }
   0x5   :  { %374 = vmatprep.subr.bf16.mxu0 %v409_v0  ;;  %379 = vmatpush3.bf16.msra.mxu1 %v378_v11  ;;  %v19_v17 = vld [vmem:[%s518_s2 + $0x8] sm:$0xff]  ;;  %v27_v18 = vld [vmem:[%s516_s1 + $0x20] sm:$0x1]  ;;  %v384_v20 = vpack.c.bf16 %v114_v15, %v113_v14  ;;  %v116_v23 = vld [vmem:[%s517_s3 + $0x38] sm:$0xff]  ;;  %vm270_vm5 = vcmp.ge.s32.totalorder %v269_v48, 80  ;;  %vm271_vm6 = vcmp.lt.s32.totalorder %v269_v48, 96 }
   0x6   :  { %380 = vmatprep.subr.bf16.mxu1 %v409_v0  ;;  %v17_v19 = vld [vmem:[%s519_s0] sm:$0x3]  ;;  %v396_v22 = vpack.c.bf16 %v19_v17, %v18_v16  ;;  %v20_v24 = vld [vmem:[%s518_s2 + $0x10] sm:$0xff]  ;;  %v21_v25 = vld [vmem:[%s518_s2 + $0x18] sm:$0xff]  ;;  %v387_v26 = vpack.c.bf16 %v116_v23, %v115_v21 }
   0x7   :  { %v399_v27 = vpack.c.bf16 %v21_v25, %v20_v24  ;;  %v117_v28 = vld [vmem:[%s517_s3 + $0x40] sm:$0xff]  ;;  %v118_v29 = vld [vmem:[%s517_s3 + $0x48] sm:$0xff]  ;;  %v119_v31 = vld [vmem:[%s517_s3 + $0x50] sm:$0xff] }
   0x8   :  { %376 = vmatpush3.bf16.msra.mxu0 %v375_v10  ;;  %v390_v30 = vpack.c.bf16 %v118_v29, %v117_v28  ;;  %v120_v32 = vld [vmem:[%s517_s3 + $0x58] sm:$0xff]  ;;  %v22_v34 = vld [vmem:[%s518_s2 + $0x20] sm:$0x1]  ;;  %vm272_vm7 = vmand %vm270_vm5, %vm271_vm6 }
   0x9   :  { %326 = vmatprep.subr.mxu0 %v411_v4  ;;  %382 = vmatpush3.bf16.msra.mxu1 %v381_v13  ;;  %v393_v33 = vpack.c.bf16 %v120_v32, %v119_v31 }
   0xa   :  { %383 = vmatprep.subr.bf16.mxu1 %v409_v0 }
   0xc   :  { %327 = vmatpush3.msk.msra.mxu0 %vm32_vm1, %v27_v18 }
   0xd   :  { %329 = vmatmul.mubr.msk.f32.vlgmr.msra.gmra.mrb[0].mxu0 %vm28_vm2, %v17_v19  ;;  %395 = vmatprep.subr.bf16.mxu0 %v409_v0 }
   0xe   :  { %385 = vmatpush3.bf16.msra.mxu1 %v384_v20  ;;  %397 = vmatpush3.bf16.msra.mxu0 %v396_v22 }
   0xf   :  { %386 = vmatprep.subr.bf16.mxu1 %v409_v0  ;;  %398 = vmatprep.subr.bf16.mxu0 %v409_v0 }
  0x10   :  { %368 = vmatprep.mubr.msk.f32.mxu0 %vm410_vm0, %v411_v4 }
  0x12   :  { %388 = vmatpush3.bf16.msra.mxu1 %v387_v26  ;;  %400 = vmatpush3.bf16.msra.mxu0 %v399_v27 }
  0x13   :  { %389 = vmatprep.subr.bf16.mxu1 %v409_v0  ;;  %366 = vmatprep.subr.mxu0 %v411_v4 }
  0x16   :  { %391 = vmatpush3.bf16.msra.mxu1 %v390_v30  ;;  %367 = vmatpush3.msk.msra.mxu0 %vm32_vm1, %v22_v34 }
  0x17   :  { %392 = vmatprep.subr.bf16.mxu1 %v409_v0  ;;  %369 = vmatmul.mubr.msk.f32.vlgmr.msra.gmra.mrb[2].mxu0 %vm28_vm2, %v17_v19 }
  0x1a   :  { %394 = vmatpush3.bf16.msra.mxu1 %v393_v33 }
  0xe0   :  { %v102_v35 = vpop.f32.mrb[0].mxu0 }
  0xe1   :  { %vm106_vm3 = vcmp.ge.f32.partialorder %v102_v35, 0.0  ;;  %v107_v36 = vmul.f32 0.2, %v102_v35  ;;  %v330_v37 = vpop.f32.mrb[1].mxu0 }
  0xe3   :  { %v108_v38 = vsel %vm106_vm3, %v102_v35, %v107_v36 }
  0xe4   :  { %356 = vmatmul.mubr.msk.f32.vlgmr.msra.gmra.mrb[0].mxu1 %vm121_vm4, %v108_v38 }
  0xea   :  { %v264_v39 = vpop.f32.mrb[2].mxu0 }
  0xeb   :  { %v370_v40 = vpop.f32.mrb[3].mxu0 }
 0x1b7   :  { %v191_v41 = vpop.f32.mrb[0].mxu1 }
 0x1b8   :  { %v265_v42 = vadd.f32 %v264_v39, %v191_v41  ;;  %v357_v43 = vpop.f32.mrb[1].mxu1 }
 0x1ba   :  { %v292_v44 = vmul.f32 -1.442695, %v265_v42 }
 0x1bc   :  { %405 = vpow2.f32 %v292_v44 }
 0x1c6   :  { %v406_v45 = vpop.eup %405 }
 0x1c7   :  { %v276_v46 = vadd.f32 1.0, %v406_v45 }
 0x1c9   :  { %407 = vrcp.f32 %v276_v46 }
 0x1d3   :  { %v408_v49 = vpop.eup %407 }
 0x1d4   :  { %v279_v50 = vmul.f32 1.1, %v408_v49 }
 0x1d6   :  { %v280_v51 = vadd.f32 0.4, %v279_v50 }
 0x1d8   :  { %v281_v52 = vsel %vm272_vm7, %v280_v51, %v265_v42 }
 0x1d9   :  { %282 = vst [vmem:[%s520_s4] sm:$0x3] %v281_v52 }

</bundles_post_ra>
